<compile_context>
chip_gen: v6e
topology: v6e:2x2x1
jax: 0.10.0
libtpu: 0.0.40
codegen_flags: <defaults>
</compile_context>

<pallas_src>
import functools

import jax
import jax.numpy as jnp
from jax import lax
from jax.experimental import pallas as pl
from jax.experimental.pallas import tpu as pltpu

OUT_DIM = 200      # logical output width of the 2nd Linear (PyTorch spec)
OUT_PAD = 256      # lane-aligned padded width (multiple of 128)
BN_EPS = 1e-5


def _round_up(x, m):
    return ((x + m - 1) // m) * m


# -----------------------------------------------------------------------------
# Kernel
# -----------------------------------------------------------------------------
def _descriptor_reg_kernel(h_ref, w1_ref, gb_ref, w2_ref, b2_ref, label_ref,
                           loss_ref, bn_ref, part_ref, *, inv_n):
    p = pl.program_id(0)                 # 0: BN-stats pass, 1: loss pass
    t = pl.program_id(1)                 # batch tile
    last_t = pl.num_programs(1) - 1

    # Linear-1 (needed in both phases; recomputed in phase 1 to keep VMEM
    # bounded at large B). bf16 cast happens in-kernel (hides under MXU/DMA).
    # b1 omitted: training-mode BN subtracts the batch mean -> exact cancel.
    z1 = jnp.dot(h_ref[...].astype(jnp.bfloat16), w1_ref[...],
                 preferred_element_type=jnp.float32)

    # -------- phase 0: accumulate per-feature sum / sum-of-squares ----------
    @pl.when(jnp.logical_and(p == 0, t == 0))
    def _():
        bn_ref[...] = jnp.zeros_like(bn_ref)

    @pl.when(p == 0)
    def _():
        bn_ref[0:1, :] += jnp.sum(z1, axis=0, keepdims=True)
        bn_ref[1:2, :] += jnp.sum(z1 * z1, axis=0, keepdims=True)

    # -------- phase-1 prologue: collapse BN into per-feature scale/shift ----
    @pl.when(jnp.logical_and(p == 1, t == 0))
    def _():
        mean = bn_ref[0:1, :] * inv_n
        var = jnp.maximum(bn_ref[1:2, :] * inv_n - mean * mean, 0.0)
        scale = gb_ref[0:1, :] * lax.rsqrt(var + BN_EPS)     # rsqrt -> EUP slot
        shift = gb_ref[1:2, :] - mean * scale
        bn_ref[0:1, :] = scale        # reuse the stats scratch in place
        bn_ref[1:2, :] = shift
        part_ref[...] = jnp.zeros_like(part_ref)

    # -------- phase 1: scale/shift + ReLU + Linear-2 + masked SSE -----------
    @pl.when(p == 1)
    def _():
        a = jnp.maximum(z1 * bn_ref[0:1, :] + bn_ref[1:2, :], 0.0)
        pred = jnp.dot(a.astype(jnp.bfloat16), w2_ref[...],
                       preferred_element_type=jnp.float32) + b2_ref[...]
        label = label_ref[...]
        nan_mask = jnp.isnan(label)                  # NaN pad cols auto-masked
        safe_label = jnp.where(nan_mask, 0.0, label)
        diff = jnp.where(nan_mask, 0.0, pred - safe_label)
        part_ref[0:1, :] += jnp.sum(diff * diff, axis=0, keepdims=True)
        part_ref[1:2, :] += jnp.sum(jnp.where(nan_mask, 0.0, 1.0),
                                    axis=0, keepdims=True)

    # -------- finalize -------------------------------------------------------
    @pl.when(jnp.logical_and(p == 1, t == last_t))
    def _():
        sq = jnp.sum(part_ref[0:1, :], axis=1, keepdims=True)     # (1, 1)
        cnt = jnp.sum(part_ref[1:2, :], axis=1, keepdims=True)    # (1, 1)
        loss_ref[...] = sq / jnp.maximum(cnt, 1.0)   # guard all-NaN batch


# -----------------------------------------------------------------------------
# Wrapper
# -----------------------------------------------------------------------------
def descriptor_reg_loss(h_pad, label_pad, params, *, tile_b=256):
    """h_pad: [B, in_pad] f32 (zero-padded); label_pad: [B, 256] f32 (NaN-padded)."""
    B, in_pad = h_pad.shape
    hid_pad = params["w1_t"].shape[1]
    assert in_pad % 128 == 0 and hid_pad % 128 == 0
    tile_b = min(tile_b, B)
    assert B % tile_b == 0, "B must be a multiple of tile_b (exact BN batch stats)"
    assert tile_b % 8 == 0, "tile_b must be a multiple of 8 (16+ preferred for bf16)"
    nt = B // tile_b

    kern = functools.partial(_descriptor_reg_kernel, inv_n=1.0 / B)

    flops = int(2 * 2 * B * in_pad * hid_pad        # Linear-1 (both phases)
                + 2 * B * hid_pad * OUT_PAD         # Linear-2
                + 10 * B * (hid_pad + OUT_PAD))     # BN/ReLU/mask elementwise
    bytes_accessed = int(2 * h_pad.size * 4 + label_pad.size * 4
                         + params["w1_t"].size * 2 + params["w2_t"].size * 2
                         + params["gb"].size * 4 + params["b2"].size * 4 + 4)

    out = pl.pallas_call(
        kern,
        out_shape=jax.ShapeDtypeStruct((1, 1), jnp.float32),
        grid_spec=pltpu.PrefetchScalarGridSpec(
            num_scalar_prefetch=0,
            grid=(2, nt),                                   # (phase, batch tile)
            in_specs=[
                pl.BlockSpec((tile_b, in_pad), lambda p, t: (t, 0)),     # h
                pl.BlockSpec((in_pad, hid_pad), lambda p, t: (0, 0)),    # w1_t (resident)
                pl.BlockSpec((2, hid_pad), lambda p, t: (0, 0)),         # gamma/beta
                pl.BlockSpec((hid_pad, OUT_PAD), lambda p, t: (0, 0)),   # w2_t (resident)
                pl.BlockSpec((1, OUT_PAD), lambda p, t: (0, 0)),         # b2
                # label only read in phase 1: pin to block 0 during phase 0
                pl.BlockSpec((tile_b, OUT_PAD), lambda p, t: (p * t, 0)),
            ],
            out_specs=pl.BlockSpec((1, 1), lambda p, t: (0, 0)),
            scratch_shapes=[
                pltpu.VMEM((2, hid_pad), jnp.float32),   # sum/sumsq -> scale/shift
                pltpu.VMEM((2, OUT_PAD), jnp.float32),   # per-lane sq_sum / count
            ]),
        compiler_params=pltpu.CompilerParams(
            dimension_semantics=("arbitrary", "arbitrary"),
            vmem_limit_bytes=48 * 1024 * 1024),
        cost_estimate=pl.CostEstimate(flops=flops, transcendentals=hid_pad,
                                      bytes_accessed=bytes_accessed),
    )(h_pad, params["w1_t"], params["gb"], params["w2_t"], params["b2"],
      label_pad)
    return out[0, 0]


# -----------------------------------------------------------------------------
# Parameter / data preparation (one-time, outside the per-step path)
# -----------------------------------------------------------------------------
def xavier_uniform(key, shape):
    fan_out, fan_in = shape                       # PyTorch Linear weight [out, in]
    bound = jnp.sqrt(6.0 / (fan_in + fan_out))
    return jax.random.uniform(key, shape, jnp.float32, minval=-bound, maxval=bound)


def init_raw_params(key, in_dim, hidden_dim, out_dim=OUT_DIM):
    k1, k2 = jax.random.split(key)
    return {
        "w1": xavier_uniform(k1, (hidden_dim, in_dim)),   # [hidden, in]
        "w2": xavier_uniform(k2, (out_dim, hidden_dim)),  # [200, hidden]
        # biases zero-init per reset_parameters(); b1 dropped (BN cancels it),
        # b2 kept (zeros) since it survives into pred.
    }


def pack_params(raw, in_dim, hidden_dim, out_dim=OUT_DIM):
    in_pad = _round_up(in_dim, 128)
    hid_pad = _round_up(hidden_dim, 128)
    w1_t = jnp.zeros((in_pad, hid_pad), jnp.float32)
    w1_t = w1_t.at[:in_dim, :hidden_dim].set(jnp.transpose(raw["w1"]))
    w2_t = jnp.zeros((hid_pad, OUT_PAD), jnp.float32)
    w2_t = w2_t.at[:hidden_dim, :out_dim].set(jnp.transpose(raw["w2"]))
    gamma = jnp.ones((hid_pad,), jnp.float32)     # pad value arbitrary (1.0)
    beta = jnp.zeros((hid_pad,), jnp.float32)     # pad value MUST be 0
    return {
        "w1_t": w1_t.astype(jnp.bfloat16),        # [in_pad, hid_pad]
        "gb": jnp.stack([gamma, beta], axis=0),   # [2, hid_pad] f32
        "w2_t": w2_t.astype(jnp.bfloat16),        # [hid_pad, 256]
        "b2": jnp.zeros((1, OUT_PAD), jnp.float32),
    }


def prepare_inputs(h_g, label_desc):
    """One-time pad/cast, hoisted out of the per-step loss call."""
    B, d = h_g.shape
    in_pad = _round_up(d, 128)
    h_pad = jnp.pad(h_g.astype(jnp.float32), ((0, 0), (0, in_pad - d)))
    lab = label_desc.astype(jnp.float32)
    pad = OUT_PAD - lab.shape[1]
    if pad > 0:
        lab = jnp.pad(lab, ((0, 0), (0, pad)), constant_values=jnp.nan)
    return h_pad, lab


# -----------------------------------------------------------------------------
# Pure-JAX f32 reference (matches the PyTorch forward)
# -----------------------------------------------------------------------------
def reference_loss(h, label, raw):
    z1 = h @ raw["w1"].T                                   # b1 = 0
    mean = jnp.mean(z1, axis=0, keepdims=True)
    var = jnp.mean((z1 - mean) ** 2, axis=0, keepdims=True)
    a = jnp.maximum((z1 - mean) * lax.rsqrt(var + BN_EPS), 0.0)   # gamma=1, beta=0
    pred = a @ raw["w2"].T                                 # b2 = 0
    mask = jnp.isnan(label)
    diff = jnp.where(mask, 0.0, pred - jnp.where(mask, 0.0, label))
    return jnp.sum(diff * diff) / jnp.sum(jnp.where(mask, 0.0, 1.0))


# -----------------------------------------------------------------------------
if __name__ == "__main__":
    B, in_dim, hidden_dim, out_dim = 32, 32, 32, OUT_DIM

    key = jax.random.PRNGKey(0)
    k_param, k_h, k_label, k_mask = jax.random.split(key, 4)

    raw = init_raw_params(k_param, in_dim, hidden_dim)
    params = pack_params(raw, in_dim, hidden_dim)

    h_g = jax.random.normal(k_h, (B, in_dim), jnp.float32)
    label_desc = jax.random.normal(k_label, (B, out_dim), jnp.float32)
    nan_sites = jax.random.uniform(k_mask, (B, out_dim)) < 0.2   # ~20% NaN labels
    label_desc = jnp.where(nan_sites, jnp.nan, label_desc)

    # One-time data prep (not part of the per-step loss path).
    h_pad, label_pad = prepare_inputs(h_g, label_desc)

    loss_fn = jax.jit(functools.partial(descriptor_reg_loss, tile_b=16))
    loss = loss_fn(h_pad, label_pad, params)
    jax.block_until_ready(loss)

    ref = reference_loss(h_g, label_desc, raw)
    assert jnp.isfinite(loss), f"non-finite loss: {loss}"
    rel_err = jnp.abs(loss - ref) / jnp.maximum(jnp.abs(ref), 1e-6)
    assert rel_err < 5e-2, f"kernel {loss} vs reference {ref} (rel_err={rel_err})"
    print("KERNEL_OK")
</pallas_src>

<mosaic_0001>
module attributes {stable_mosaic.version = 11 : i64} {
  func.func @_descriptor_reg_kernel(%arg0: i32, %arg1: i32, %arg2: memref<16x128xf32, #tpu.memory_space<vmem>>, %arg3: memref<128x128xbf16, #tpu.memory_space<vmem>>, %arg4: memref<2x128xf32, #tpu.memory_space<vmem>>, %arg5: memref<128x256xbf16, #tpu.memory_space<vmem>>, %arg6: memref<1x256xf32, #tpu.memory_space<vmem>>, %arg7: memref<16x256xf32, #tpu.memory_space<vmem>>, %arg8: memref<1x1xf32, #tpu.memory_space<vmem>>, %arg9: memref<2x128xf32, #tpu.memory_space<vmem>>, %arg10: memref<2x256xf32, #tpu.memory_space<vmem>>) attributes {dimension_semantics = [#tpu.dimension_semantics<arbitrary>, #tpu.dimension_semantics<arbitrary>], iteration_bounds = array<i64: 2, 2>, scalar_prefetch = 0 : i64, scratch_operands = 2 : i64, tpu.core_type = #tpu.core_type<tc>, window_params = [{transform_indices = @transform_0, window_bounds = array<i64: 16, 128>}, {pipeline_mode = #tpu.pipeline_mode<synchronous>, transform_indices = @transform_1, window_bounds = array<i64: 128, 128>}, {pipeline_mode = #tpu.pipeline_mode<synchronous>, transform_indices = @transform_2, window_bounds = array<i64: 2, 128>}, {pipeline_mode = #tpu.pipeline_mode<synchronous>, transform_indices = @transform_3, window_bounds = array<i64: 128, 256>}, {pipeline_mode = #tpu.pipeline_mode<synchronous>, transform_indices = @transform_4, window_bounds = array<i64: 1, 256>}, {transform_indices = @transform_5, window_bounds = array<i64: 16, 256>}, {pipeline_mode = #tpu.pipeline_mode<synchronous>, transform_indices = @transform_6, window_bounds = array<i64: 1, 1>}]} {
    %c0 = arith.constant 0 : index
    %c0_0 = arith.constant 0 : index
    %0 = vector.load %arg2[%c0, %c0_0] : memref<16x128xf32, #tpu.memory_space<vmem>>, vector<16x128xf32>
    %1 = arith.truncf %0 : vector<16x128xf32> to vector<16x128xbf16>
    %c0_1 = arith.constant 0 : index
    %c0_2 = arith.constant 0 : index
    %2 = vector.load %arg3[%c0_1, %c0_2] : memref<128x128xbf16, #tpu.memory_space<vmem>>, vector<128x128xbf16>
    %cst = arith.constant dense<0.000000e+00> : vector<16x128xf32>
    %3 = tpu.matmul %1, %2, %cst {dimension_numbers = #tpu.dot_dimension_numbers<[1], [0], [0], [1], [0, 0, 1, 1], [], []>} : vector<16x128xbf16>, vector<128x128xbf16>, vector<16x128xf32> -> vector<16x128xf32>
    %c0_i32 = arith.constant 0 : i32
    %4 = arith.cmpi eq, %arg0, %c0_i32 : i32
    %c0_i32_3 = arith.constant 0 : i32
    %5 = arith.cmpi eq, %arg1, %c0_i32_3 : i32
    %6 = arith.andi %4, %5 : i1
    %7 = arith.extui %6 : i1 to i32
    %c0_i32_4 = arith.constant 0 : i32
    %8 = arith.cmpi ne, %7, %c0_i32_4 : i32
    scf.if %8 {
      %cst_14 = arith.constant 0.000000e+00 : f32
      %25 = vector.broadcast %cst_14 : f32 to vector<2x128xf32>
      %c0_15 = arith.constant 0 : index
      %c0_16 = arith.constant 0 : index
      %26 = vector.load %arg9[%c0_15, %c0_16] : memref<2x128xf32, #tpu.memory_space<vmem>>, vector<2x128xf32>
      tpu.vector_store %arg9[%c0_15, %c0_16], %25 {strides = array<i32>} : memref<2x128xf32, #tpu.memory_space<vmem>>, vector<2x128xf32>,
    } else {
    }
    %c0_i32_5 = arith.constant 0 : i32
    %9 = arith.cmpi eq, %arg0, %c0_i32_5 : i32
    %10 = arith.extui %9 : i1 to i32
    %c0_i32_6 = arith.constant 0 : i32
    %11 = arith.cmpi ne, %10, %c0_i32_6 : i32
    scf.if %11 {
      %c0_14 = arith.constant 0 : index
      %c0_15 = arith.constant 0 : index
      %25 = vector.load %arg9[%c0_14, %c0_15] : memref<2x128xf32, #tpu.memory_space<vmem>>, vector<1x128xf32>
      %cst_16 = arith.constant dense<0.000000e+00> : vector<128xf32>
      %26 = vector.multi_reduction <add>, %3, %cst_16 [0] : vector<16x128xf32> to vector<128xf32>
      %27 = vector.shape_cast %26 : vector<128xf32> to vector<1x128xf32>
      %28 = arith.addf %25, %27 : vector<1x128xf32>
      %c0_17 = arith.constant 0 : index
      %c0_18 = arith.constant 0 : index
      %29 = vector.load %arg9[%c0_17, %c0_18] : memref<2x128xf32, #tpu.memory_space<vmem>>, vector<1x128xf32>
      tpu.vector_store %arg9[%c0_17, %c0_18], %28 {strides = array<i32>} : memref<2x128xf32, #tpu.memory_space<vmem>>, vector<1x128xf32>,
      %c1 = arith.constant 1 : index
      %c0_19 = arith.constant 0 : index
      %30 = vector.load %arg9[%c1, %c0_19] : memref<2x128xf32, #tpu.memory_space<vmem>>, vector<1x128xf32>
      %31 = arith.mulf %3, %3 : vector<16x128xf32>
      %cst_20 = arith.constant dense<0.000000e+00> : vector<128xf32>
      %32 = vector.multi_reduction <add>, %31, %cst_20 [0] : vector<16x128xf32> to vector<128xf32>
      %33 = vector.shape_cast %32 : vector<128xf32> to vector<1x128xf32>
      %34 = arith.addf %30, %33 : vector<1x128xf32>
      %c1_21 = arith.constant 1 : index
      %c0_22 = arith.constant 0 : index
      %35 = vector.load %arg9[%c1_21, %c0_22] : memref<2x128xf32, #tpu.memory_space<vmem>>, vector<1x128xf32>
      tpu.vector_store %arg9[%c1_21, %c0_22], %34 {strides = array<i32>} : memref<2x128xf32, #tpu.memory_space<vmem>>, vector<1x128xf32>,
    } else {
    }
    %c1_i32 = arith.constant 1 : i32
    %12 = arith.cmpi eq, %arg0, %c1_i32 : i32
    %c0_i32_7 = arith.constant 0 : i32
    %13 = arith.cmpi eq, %arg1, %c0_i32_7 : i32
    %14 = arith.andi %12, %13 : i1
    %15 = arith.extui %14 : i1 to i32
    %c0_i32_8 = arith.constant 0 : i32
    %16 = arith.cmpi ne, %15, %c0_i32_8 : i32
    scf.if %16 {
      %c0_14 = arith.constant 0 : index
      %c0_15 = arith.constant 0 : index
      %25 = vector.load %arg9[%c0_14, %c0_15] : memref<2x128xf32, #tpu.memory_space<vmem>>, vector<1x128xf32>
      %cst_16 = arith.constant 3.125000e-02 : f32
      %26 = vector.broadcast %cst_16 : f32 to vector<1x128xf32>
      %27 = arith.mulf %25, %26 : vector<1x128xf32>
      %c1 = arith.constant 1 : index
      %c0_17 = arith.constant 0 : index
      %28 = vector.load %arg9[%c1, %c0_17] : memref<2x128xf32, #tpu.memory_space<vmem>>, vector<1x128xf32>
      %cst_18 = arith.constant 3.125000e-02 : f32
      %29 = vector.broadcast %cst_18 : f32 to vector<1x128xf32>
      %30 = arith.mulf %28, %29 : vector<1x128xf32>
      %31 = arith.mulf %27, %27 : vector<1x128xf32>
      %32 = arith.subf %30, %31 : vector<1x128xf32>
      %cst_19 = arith.constant 0.000000e+00 : f32
      %33 = vector.broadcast %cst_19 : f32 to vector<1x128xf32>
      %34 = arith.maximumf %32, %33 : vector<1x128xf32>
      %c0_20 = arith.constant 0 : index
      %c0_21 = arith.constant 0 : index
      %35 = vector.load %arg4[%c0_20, %c0_21] : memref<2x128xf32, #tpu.memory_space<vmem>>, vector<1x128xf32>
      %cst_22 = arith.constant 9.99999974E-6 : f32
      %36 = vector.broadcast %cst_22 : f32 to vector<1x128xf32>
      %37 = arith.addf %34, %36 : vector<1x128xf32>
      %38 = math.rsqrt %37 : vector<1x128xf32>
      %39 = arith.mulf %35, %38 : vector<1x128xf32>
      %c1_23 = arith.constant 1 : index
      %c0_24 = arith.constant 0 : index
      %40 = vector.load %arg4[%c1_23, %c0_24] : memref<2x128xf32, #tpu.memory_space<vmem>>, vector<1x128xf32>
      %41 = arith.mulf %27, %39 : vector<1x128xf32>
      %42 = arith.subf %40, %41 : vector<1x128xf32>
      %c0_25 = arith.constant 0 : index
      %c0_26 = arith.constant 0 : index
      %43 = vector.load %arg9[%c0_25, %c0_26] : memref<2x128xf32, #tpu.memory_space<vmem>>, vector<1x128xf32>
      tpu.vector_store %arg9[%c0_25, %c0_26], %39 {strides = array<i32>} : memref<2x128xf32, #tpu.memory_space<vmem>>, vector<1x128xf32>,
      %c1_27 = arith.constant 1 : index
      %c0_28 = arith.constant 0 : index
      %44 = vector.load %arg9[%c1_27, %c0_28] : memref<2x128xf32, #tpu.memory_space<vmem>>, vector<1x128xf32>
      tpu.vector_store %arg9[%c1_27, %c0_28], %42 {strides = array<i32>} : memref<2x128xf32, #tpu.memory_space<vmem>>, vector<1x128xf32>,
      %cst_29 = arith.constant 0.000000e+00 : f32
      %45 = vector.broadcast %cst_29 : f32 to vector<2x256xf32>
      %c0_30 = arith.constant 0 : index
      %c0_31 = arith.constant 0 : index
      %46 = vector.load %arg10[%c0_30, %c0_31] : memref<2x256xf32, #tpu.memory_space<vmem>>, vector<2x256xf32>
      tpu.vector_store %arg10[%c0_30, %c0_31], %45 {strides = array<i32>} : memref<2x256xf32, #tpu.memory_space<vmem>>, vector<2x256xf32>,
    } else {
    }
    %c1_i32_9 = arith.constant 1 : i32
    %17 = arith.cmpi eq, %arg0, %c1_i32_9 : i32
    %18 = arith.extui %17 : i1 to i32
    %c0_i32_10 = arith.constant 0 : i32
    %19 = arith.cmpi ne, %18, %c0_i32_10 : i32
    scf.if %19 {
      %c0_14 = arith.constant 0 : index
      %c0_15 = arith.constant 0 : index
      %25 = vector.load %arg9[%c0_14, %c0_15] : memref<2x128xf32, #tpu.memory_space<vmem>>, vector<1x128xf32>
      %26 = vector.broadcast %25 : vector<1x128xf32> to vector<16x128xf32>
      %27 = arith.mulf %3, %26 : vector<16x128xf32>
      %c1 = arith.constant 1 : index
      %c0_16 = arith.constant 0 : index
      %28 = vector.load %arg9[%c1, %c0_16] : memref<2x128xf32, #tpu.memory_space<vmem>>, vector<1x128xf32>
      %29 = vector.broadcast %28 : vector<1x128xf32> to vector<16x128xf32>
      %30 = arith.addf %27, %29 : vector<16x128xf32>
      %cst_17 = arith.constant 0.000000e+00 : f32
      %31 = vector.broadcast %cst_17 : f32 to vector<16x128xf32>
      %32 = arith.maximumf %30, %31 : vector<16x128xf32>
      %33 = arith.truncf %32 : vector<16x128xf32> to vector<16x128xbf16>
      %c0_18 = arith.constant 0 : index
      %c0_19 = arith.constant 0 : index
      %34 = vector.load %arg5[%c0_18, %c0_19] : memref<128x256xbf16, #tpu.memory_space<vmem>>, vector<128x256xbf16>
      %cst_20 = arith.constant dense<0.000000e+00> : vector<16x256xf32>
      %35 = tpu.matmul %33, %34, %cst_20 {dimension_numbers = #tpu.dot_dimension_numbers<[1], [0], [0], [1], [0, 0, 1, 1], [], []>} : vector<16x128xbf16>, vector<128x256xbf16>, vector<16x256xf32> -> vector<16x256xf32>
      %c0_21 = arith.constant 0 : index
      %c0_22 = arith.constant 0 : index
      %36 = vector.load %arg6[%c0_21, %c0_22] : memref<1x256xf32, #tpu.memory_space<vmem>>, vector<1x256xf32>
      %37 = vector.broadcast %36 : vector<1x256xf32> to vector<16x256xf32>
      %38 = arith.addf %35, %37 : vector<16x256xf32>
      %c0_23 = arith.constant 0 : index
      %c0_24 = arith.constant 0 : index
      %39 = vector.load %arg7[%c0_23, %c0_24] : memref<16x256xf32, #tpu.memory_space<vmem>>, vector<16x256xf32>
      %40 = arith.cmpf one, %39, %39 : vector<16x256xf32>
      %cst_25 = arith.constant 0.000000e+00 : f32
      %41 = vector.broadcast %cst_25 : f32 to vector<16x256xf32>
      %42 = arith.select %40, %41, %39 : vector<16x256xi1>, vector<16x256xf32>
      %43 = arith.subf %38, %42 : vector<16x256xf32>
      %cst_26 = arith.constant 0.000000e+00 : f32
      %44 = vector.broadcast %cst_26 : f32 to vector<16x256xf32>
      %45 = arith.select %40, %44, %43 : vector<16x256xi1>, vector<16x256xf32>
      %c0_27 = arith.constant 0 : index
      %c0_28 = arith.constant 0 : index
      %46 = vector.load %arg10[%c0_27, %c0_28] : memref<2x256xf32, #tpu.memory_space<vmem>>, vector<1x256xf32>
      %47 = arith.mulf %45, %45 : vector<16x256xf32>
      %cst_29 = arith.constant dense<0.000000e+00> : vector<256xf32>
      %48 = vector.multi_reduction <add>, %47, %cst_29 [0] : vector<16x256xf32> to vector<256xf32>
      %49 = vector.shape_cast %48 : vector<256xf32> to vector<1x256xf32>
      %50 = arith.addf %46, %49 : vector<1x256xf32>
      %c0_30 = arith.constant 0 : index
      %c0_31 = arith.constant 0 : index
      %51 = vector.load %arg10[%c0_30, %c0_31] : memref<2x256xf32, #tpu.memory_space<vmem>>, vector<1x256xf32>
      tpu.vector_store %arg10[%c0_30, %c0_31], %50 {strides = array<i32>} : memref<2x256xf32, #tpu.memory_space<vmem>>, vector<1x256xf32>,
      %c1_32 = arith.constant 1 : index
      %c0_33 = arith.constant 0 : index
      %52 = vector.load %arg10[%c1_32, %c0_33] : memref<2x256xf32, #tpu.memory_space<vmem>>, vector<1x256xf32>
      %cst_34 = arith.constant 0.000000e+00 : f32
      %cst_35 = arith.constant 1.000000e+00 : f32
      %53 = vector.broadcast %cst_34 : f32 to vector<16x256xf32>
      %54 = vector.broadcast %cst_35 : f32 to vector<16x256xf32>
      %55 = arith.select %40, %53, %54 : vector<16x256xi1>, vector<16x256xf32>
      %cst_36 = arith.constant dense<0.000000e+00> : vector<256xf32>
      %56 = vector.multi_reduction <add>, %55, %cst_36 [0] : vector<16x256xf32> to vector<256xf32>
      %57 = vector.shape_cast %56 : vector<256xf32> to vector<1x256xf32>
      %58 = arith.addf %52, %57 : vector<1x256xf32>
      %c1_37 = arith.constant 1 : index
      %c0_38 = arith.constant 0 : index
      %59 = vector.load %arg10[%c1_37, %c0_38] : memref<2x256xf32, #tpu.memory_space<vmem>>, vector<1x256xf32>
      tpu.vector_store %arg10[%c1_37, %c0_38], %58 {strides = array<i32>} : memref<2x256xf32, #tpu.memory_space<vmem>>, vector<1x256xf32>,
    } else {
    }
    %c1_i32_11 = arith.constant 1 : i32
    %20 = arith.cmpi eq, %arg0, %c1_i32_11 : i32
    %c1_i32_12 = arith.constant 1 : i32
    %21 = arith.cmpi eq, %arg1, %c1_i32_12 : i32
    %22 = arith.andi %20, %21 : i1
    %23 = arith.extui %22 : i1 to i32
    %c0_i32_13 = arith.constant 0 : i32
    %24 = arith.cmpi ne, %23, %c0_i32_13 : i32
    scf.if %24 {
      %c0_14 = arith.constant 0 : index
      %c0_15 = arith.constant 0 : index
      %25 = vector.load %arg10[%c0_14, %c0_15] : memref<2x256xf32, #tpu.memory_space<vmem>>, vector<1x256xf32>
      %cst_16 = arith.constant dense<0.000000e+00> : vector<1xf32>
      %26 = vector.multi_reduction <add>, %25, %cst_16 [1] : vector<1x256xf32> to vector<1xf32>
      %27 = vector.shape_cast %26 : vector<1xf32> to vector<1x1xf32>
      %c1 = arith.constant 1 : index
      %c0_17 = arith.constant 0 : index
      %28 = vector.load %arg10[%c1, %c0_17] : memref<2x256xf32, #tpu.memory_space<vmem>>, vector<1x256xf32>
      %cst_18 = arith.constant dense<0.000000e+00> : vector<1xf32>
      %29 = vector.multi_reduction <add>, %28, %cst_18 [1] : vector<1x256xf32> to vector<1xf32>
      %30 = vector.shape_cast %29 : vector<1xf32> to vector<1x1xf32>
      %cst_19 = arith.constant 1.000000e+00 : f32
      %31 = vector.broadcast %cst_19 : f32 to vector<1x1xf32>
      %32 = arith.maximumf %30, %31 : vector<1x1xf32>
      %33 = arith.divf %27, %32 : vector<1x1xf32>
      %c0_20 = arith.constant 0 : index
      %c0_21 = arith.constant 0 : index
      %34 = vector.load %arg8[%c0_20, %c0_21] : memref<1x1xf32, #tpu.memory_space<vmem>>, vector<1x1xf32>
      tpu.vector_store %arg8[%c0_20, %c0_21], %33 {strides = array<i32>} : memref<1x1xf32, #tpu.memory_space<vmem>>, vector<1x1xf32>,
    } else {
    }
    return
  }
  func.func @transform_0(%arg0: i32, %arg1: i32) -> (i32, i32) {
    %c0_i32 = arith.constant 0 : i32
    %c0_i32_0 = arith.constant 0 : i32
    return %arg1, %c0_i32 : i32, i32
  }
  func.func @transform_1(%arg0: i32, %arg1: i32) -> (i32, i32) {
    %c0_i32 = arith.constant 0 : i32
    %c0_i32_0 = arith.constant 0 : i32
    %c0_i32_1 = arith.constant 0 : i32
    return %c0_i32, %c0_i32_0 : i32, i32
  }
  func.func @transform_2(%arg0: i32, %arg1: i32) -> (i32, i32) {
    %c0_i32 = arith.constant 0 : i32
    %c0_i32_0 = arith.constant 0 : i32
    %c0_i32_1 = arith.constant 0 : i32
    return %c0_i32, %c0_i32_0 : i32, i32
  }
  func.func @transform_3(%arg0: i32, %arg1: i32) -> (i32, i32) {
    %c0_i32 = arith.constant 0 : i32
    %c0_i32_0 = arith.constant 0 : i32
    %c0_i32_1 = arith.constant 0 : i32
    return %c0_i32, %c0_i32_0 : i32, i32
  }
  func.func @transform_4(%arg0: i32, %arg1: i32) -> (i32, i32) {
    %c0_i32 = arith.constant 0 : i32
    %c0_i32_0 = arith.constant 0 : i32
    %c0_i32_1 = arith.constant 0 : i32
    return %c0_i32, %c0_i32_0 : i32, i32
  }
  func.func @transform_5(%arg0: i32, %arg1: i32) -> (i32, i32) {
    %0 = arith.muli %arg0, %arg1 : i32
    %c0_i32 = arith.constant 0 : i32
    %c0_i32_0 = arith.constant 0 : i32
    return %0, %c0_i32 : i32, i32
  }
  func.func @transform_6(%arg0: i32, %arg1: i32) -> (i32, i32) {
    %c0_i32 = arith.constant 0 : i32
    %c0_i32_0 = arith.constant 0 : i32
    %c0_i32_1 = arith.constant 0 : i32
    return %c0_i32, %c0_i32_0 : i32, i32
  }
}

</mosaic_0001>

<bundles_post_ra>
// kernel: descriptor_reg_loss.1
= control target key start
LH: loop header
LB: loop body
LE: loop exit
PB: predicated region body
PF: predicated region fallthrough
CT: control target
= control target key end

     0   :  { %s1877_s0 = inlined_call_operand.hbm [shape: f32[32,128], index: 0, kind: input, shape index: {}]   ;;  %s1878_s1 = inlined_call_operand.hbm [shape: bf16[128,128], index: 1, kind: input, shape index: {}]   ;;  %s1879_s2 = inlined_call_operand.vmem [shape: f32[2,128], index: 2, kind: input, shape index: {}]   ;;  %s1880_s3 = inlined_call_operand.hbm [shape: bf16[128,256], index: 3, kind: input, shape index: {}]   ;;  %s1881_s4 = inlined_call_operand.hbm [shape: f32[1,256], index: 4, kind: input, shape index: {}]   ;;  %s1882_s5 = inlined_call_operand.hbm [shape: f32[32,256], index: 5, kind: input, shape index: {}]   ;;  %s1883_s6 = inlined_call_operand.hbm [shape: f32[1,1], index: 6, kind: output, shape index: {}]  }
   0x1   :  { %1898 = sst [smem:[#allocation23_spill]] %s1878_s1 }
   0x2   :  { %1899 = sst [smem:[#allocation24_spill]] %s1879_s2 }
   0x3   :  { %1900 = sst [smem:[#allocation25_spill]] %s1883_s6 }
   0x4   :  { %11 = vsyncpa [#allocation5], 0 }
   0x5   :  { %13 = vsyncpa [#allocation5 + $0x1], 0 }
   0x6   :  { %14 = vsyncpa [#allocation8], 0 }
   0x7   :  { %15 = vsyncpa [#allocation11], 0 }
   0x8   :  { %16 = vsyncpa [#allocation6], 0  ;;  %s1547_s21 = smov 0   ;;  %s1549_s22 = smov 0  }
   0x9   :  { %s1551_s23 = smov 0   ;;  %s1553_s24 = smov 0  }
   0xa   :  { %s1555_s25 = smov 0   ;;  %s1557_s26 = smov 0  }
   0xb   :  { %s1559_s27 = smov 0   ;;  %s1561_s28 = smov 0  }
   0xc   :  { %s1563_s29 = smov 0   ;;  %s1565_s30 = smov 0  }
   0xd   :  { %s1567_s7 = smov 0  }
   0xe LB: > { %1901 = sst [smem:[#allocation19_spill]] %s1475_s27  ;;  %s1599_s8 = sadd.s32 4294967295, %s1491_s7   ;;  %s1491_s7 = sphi %s1567_s7, %s22_s7   ;;  %s1487_s30 = sphi %s1565_s30, %s1948_s30   ;;  %s1483_s29 = sphi %s1563_s29, %s1947_s29   ;;  %s1479_s28 = sphi %s1561_s28, %s1946_s28   ;;  %s1475_s27 = sphi %s1559_s27, %s1945_s27   ;;  %s1471_s26 = sphi %s1557_s26, %s1944_s26   ;;  %s1467_s25 = sphi %s1555_s25, %s1943_s25   ;;  %s1463_s24 = sphi %s1553_s24, %s1942_s24   ;;  %s1459_s23 = sphi %s1551_s23, %s1941_s23   ;;  %s1455_s22 = sphi %s1549_s22, %s1940_s22   ;;  %s1451_s21 = sphi %s1547_s21, %s1939_s21  }
   0xf   : > { %1902 = sst [smem:[#allocation20_spill]] %s1479_s28  ;;  %p54_p0 = scmp.ne.s32.totalorder %s1467_s25, %s1463_s24 }
  0x10   : > { %p1891_p1 = scmp.eq.s32.totalorder %s1599_s8, 0  ;;  %p166_p2 = scmp.ne.s32.totalorder %s1455_s22, %s1451_s21 }
  0x11   : > { %p958_p3 = scmp.ge.s32.totalorder %s1491_s7, 1  ;;  %p198_p4 = scmp.lt.s32.totalorder %s1491_s7, 5 }
  0x12   : > { %p1608_p5 = por %p1891_p1, %p54_p0  ;;  %p1614_p6 = por %p166_p2, %p1891_p1 }
  0x13   : > { %p1618_p7 = pnand %p958_p3, %p198_p4  ;;  %s1493_s12 = smov [#allocation7]  }
  0x14   : > { %s1903_s9 = scalar_select %p1608_p5, 1, 0 }
  0x15   : > { %s1905_s10 = scalar_select %p1614_p6, 1, 0 }
  0x16   : > { %1904 = sst [smem:[#allocation21_spill]] %s1903_s9  ;;  %p1060_p8 = pneg %p1618_p7 }
  0x17   : > { %1906 = sst [smem:[#allocation22_spill]] %s1905_s10  ;;  %s210_s13 = sshll.u32 %s1493_s12, 4  ;;  %s211_s13 = int_to_ptr.vmem [resolvable:$true] %s210_s13 }
  0x18   : > { %s1907_s11 = scalar_select %p1618_p7, 1, 0 }
  0x19   : > { %p1626_p9 = pnand %p1060_p8, %p1891_p1  ;;  %s1238_s15 = scalar_lea.vmem %s211_s13, 1024 }
  0x1a   : > { %p1239_p11 = scmp.ne.s32.totalorder %s211_s13, %s1238_s15  ;;  %p1246_p0 = scmp.lt.s32.totalorder %s211_s13, %s211_s13 }
  0x1b   : > { %p1894_p10 = pneg %p1626_p9  ;;  %p1247_p2 = scmp.lt.s32.totalorder %s1238_s15, %s1238_s15 }
  0x1d   : > { %p1241_p12 = pnand %p1239_p11, %p1894_p10  ;;  %p1248_p3 = por %p1247_p2, %p1246_p0 }
  0x1f   : > { %p1242_p13 = pneg %p1241_p12 }
  0x21   : > { %p1249_p4 = pnand %p1248_p3, %p1242_p13 }
  0x23   : > { %1252 = shalt.err (!%p1249_p4)
}
  0x24   : > { %s1494_s16 = smov 64   ;;  %s1495_s17 = smov 4  }
  0x25   : > { %s1909_s1 = sld [smem:[#allocation23_spill]]  ;;  %s31_s20 = sadd.s32 1, %s1483_s29 }
  0x26   : > { %p1641_p8 = scmp.ge.s32.totalorder %s31_s20, 2  ;;  %s41_s24 = sadd.s32 1, %s1471_s26 }
  0x27   : > { %p48_p11 = scmp.ne.s32.totalorder %s1471_s26, %s1467_s25  ;;  %p1892_p12 = scmp.eq.s32.totalorder %s1491_s7, 0 }
  0x28   : > { %s1950_s20 = smov (%p1641_p8, %s31_s20), 0  ;;  %p1893_p2 = scmp.lt.s32.totalorder %s1491_s7, 4 }
  0x29   : > { %p1655_p13 = por %p1892_p12, %p48_p11  ;;  %s251_s15 = sand.u32 1, %s1491_s7  }
  0x2a   : > { %s1008_s19 = sshll.u32 %s1483_s29, 8 }
  0x2b   : > { %1063 = dma.hbm_to_vmem [thread:$0]  (!%p1626_p9), %s1909_s1, 1024, %s211_s13, [#allocation8], %s1494_s16, %s1494_s16, %s1495_s17  }
  0x2c   : > { %s38_s13 = ssub.s32 %s1483_s29, %s1950_s20  ;;  %s253_s16 = sand.u32 1, %s1471_s26  }
  0x2d   : > { %p39_p0 = scmp.eq.s32.totalorder %s38_s13, 0  ;;  %s963_s18 = sshll.u32 %s253_s16, 4 }
  0x2e   : > { %s261_s2 = scalar_lea.hbm %s1877_s0, %s1008_s19  ;;  %s255_s27 = scalar_lea.vmem [#allocation4], %s963_s18 }
  0x2f   : > { %s1665_s17 = scalar_select %p39_p0, %s1471_s26, %s41_s24  }
  0x30   : > { %s262_s28 = sshll.u32 %s255_s27, 4  ;;  %p1675_p3 = pnand %p1893_p2, %p1655_p13  ;;  %s263_s28 = int_to_ptr.vmem [resolvable:$true] %s262_s28 }
  0x31   : > { %s1496_s13 = smov [#allocation9]   ;;  %s1679_s24 = scalar_lea.sflag [#allocation5], %s251_s15 }
  0x32   : > { %s226_s9 = sshll.u32 %s1496_s13, 4  ;;  %p1255_p4 = pneg %p1675_p3  ;;  %s227_s9 = int_to_ptr.vmem [resolvable:$true] %s226_s9 }
  0x33   : > { %s1266_s16 = scalar_lea.vmem %s263_s28, 256  ;;  %s1497_s1 = smov [#allocation4]  }
  0x34   : > { %p1267_p11 = scmp.ne.s32.totalorder %s263_s28, %s1266_s16  ;;  %s1271_s6 = sshll.u32 %s1497_s1, 4  ;;  %s1272_s6 = int_to_ptr.vmem [resolvable:$false] %s1271_s6 }
  0x35   : > { %s1273_s27 = scalar_lea.vmem %s1272_s6, 512  ;;  %p1274_p12 = scmp.lt.s32.totalorder %s263_s28, %s1272_s6 }
  0x36   : > { %p1269_p0 = pnand %p1267_p11, %p1255_p4  ;;  %p1275_p13 = scmp.lt.s32.totalorder %s1273_s27, %s1266_s16 }
  0x38   : > { %p1270_p1 = pneg %p1269_p0  ;;  %p1276_p2 = por %p1275_p13, %p1274_p12 }
  0x3a   : > { %p1277_p10 = pnand %p1276_p2, %p1270_p1 }
  0x3c   : > { %1280 = shalt.err (!%p1277_p10)
}
  0x3d   : > { %s1498_s12 = smov 128   ;;  %s1499_s15 = smov 8  }
  0x3e   : > { %1073 = dma.hbm_to_vmem [thread:$0]  (!%p1675_p3), %s261_s2, 256, %s263_s28, %s1679_s24, %s1498_s12, %s1498_s12, %s1499_s15  }
  0x3f   : > { %s1500_s18 = smov [#allocation10]   ;;  %s1292_s13 = scalar_lea.vmem %s227_s9, 2048 }
  0x40   : > { %s240_s19 = sshll.u32 %s1500_s18, 4  ;;  %p1293_p4 = scmp.ne.s32.totalorder %s227_s9, %s1292_s13  ;;  %s241_s19 = int_to_ptr.vmem [resolvable:$true] %s240_s19 }
  0x41   : > { %p1913_p11 = pneg %p1626_p9  ;;  %p1300_p5 = scmp.lt.s32.totalorder %s227_s9, %s227_s9 }
  0x42   : > { %p1301_p12 = scmp.lt.s32.totalorder %s1292_s13, %s1292_s13 }
  0x43   : > { %p1295_p0 = pnand %p1293_p4, %p1913_p11 }
  0x44   : > { %p1302_p1 = por %p1301_p12, %p1300_p5 }
  0x45   : > { %p1296_p6 = pneg %p1295_p0 }
  0x47   : > { %p1303_p10 = pnand %p1302_p1, %p1296_p6 }
  0x49   : > { %1306 = shalt.err (!%p1303_p10)
}
  0x4a   : > { %1066 = dma.hbm_to_vmem [thread:$0]  (!%p1626_p9), %s1880_s3, 2048, %s227_s9, [#allocation8], %s1498_s12, %s1498_s12, %s1499_s15  }
  0x4b   : > { %s1318_s2 = scalar_lea.vmem %s241_s19, 32  ;;  %p1914_p3 = pmov %p1913_p11 }
  0x4c   : > { %p1319_p2 = scmp.ne.s32.totalorder %s241_s19, %s1318_s2  ;;  %p1326_p11 = scmp.lt.s32.totalorder %s241_s19, %s241_s19 }
  0x4d   : > { %p1327_p0 = scmp.lt.s32.totalorder %s1318_s2, %s1318_s2 }
  0x4e   : > { %p1321_p13 = pnand %p1319_p2, %p1914_p3 }
  0x4f   : > { %p1328_p7 = por %p1327_p0, %p1326_p11 }
  0x50   : > { %p1322_p4 = pneg %p1321_p13 }
  0x52   : > { %p1329_p5 = pnand %p1328_p7, %p1322_p4 }
  0x54   : > { %1332 = shalt.err (!%p1329_p5)
}
  0x55   : > { %1069 = dma.hbm_to_vmem [thread:$0]  (!%p1626_p9), %s1881_s4, 32, %s241_s19, [#allocation11]  }
  0x56   : > { %s153_s9 = sadd.s32 1, %s1459_s23  ;;  %s34_s6 = sadd.s32 1, %s1487_s30 }
  0x57   : > { %s148_s27 = smul.u32 %s1483_s29, %s1487_s30  ;;  %s1952_s6 = smov (!%p1641_p8, %s34_s6), %s1487_s30 }
  0x58   : > { %p160_p6 = scmp.ne.s32.totalorder %s1459_s23, %s1455_s22  ;;  %s274_s14 = sand.u32 1, %s1459_s23  }
  0x59   : > { %p36_p7 = scmp.ge.s32.totalorder %s1952_s6, 2  ;;  %s966_s12 = sshll.u32 %s274_s14, 5 }
  0x5a   : > { %p1915_p12 = scmp.eq.s32.totalorder %s1491_s7, 0  ;;  %s1010_s15 = sshll.u32 %s148_s27, 9 }
  0x5b   : > { %s1954_s6 = smov (%p36_p7, %s1952_s6), 0  ;;  %s276_s18 = scalar_lea.vmem [#allocation12], %s966_s12 }
  0x5c   : > { %p162_p1 = por %p160_p6, %p1915_p12  ;;  %s285_s13 = sshll.u32 %s276_s18, 4  ;;  %s286_s13 = int_to_ptr.vmem [resolvable:$true] %s285_s13 }
  0x5d   : > { %s149_s19 = smul.u32 %s1954_s6, %s1950_s20  ;;  %s284_s2 = scalar_lea.hbm %s1882_s5, %s1010_s15 }
  0x5e   : > { %p1916_p9 = scmp.lt.s32.totalorder %s1491_s7, 4  ;;  %s1346_s14 = scalar_lea.vmem %s286_s13, 512 }
  0x5f   : > { %s150_s28 = ssub.s32 %s148_s27, %s149_s19  ;;  %p1347_p3 = scmp.ne.s32.totalorder %s286_s13, %s1346_s14 }
  0x60   : > { %p1723_p8 = pnand %p1916_p9, %p162_p1  ;;  %p151_p10 = scmp.eq.s32.totalorder %s150_s28, 0 }
  0x61   : > { %s1501_s12 = smov [#allocation12]  }
  0x62   : > { %s1728_s10 = scalar_select %p151_p10, %s1459_s23, %s153_s9  }
  0x63   : > { %p1335_p2 = pneg %p1723_p8  ;;  %s1351_s18 = sshll.u32 %s1501_s12, 4  ;;  %s1352_s18 = int_to_ptr.vmem [resolvable:$false] %s1351_s18 }
  0x64   : > { %s1353_s15 = scalar_lea.vmem %s1352_s18, 1024  ;;  %p1354_p11 = scmp.lt.s32.totalorder %s286_s13, %s1352_s18 }
  0x65   : > { %p1349_p13 = pnand %p1347_p3, %p1335_p2  ;;  %p1355_p0 = scmp.lt.s32.totalorder %s1353_s15, %s1346_s14 }
  0x67   : > { %p1350_p4 = pneg %p1349_p13  ;;  %p1356_p5 = por %p1355_p0, %p1354_p11 }
  0x69   : > { %p1357_p6 = pnand %p1356_p5, %p1350_p4 }
  0x6b   : > { %1360 = shalt.err (!%p1357_p6)
}
  0x6c   : > { %s1502_s16 = smov 256   ;;  %s1503_s9 = smov 16  }
  0x6d   : > { %1076 = dma.hbm_to_vmem [thread:$0]  (!%p1723_p8), %s284_s2, 512, %s286_s13, %s1679_s24, %s1502_s16, %s1502_s16, %s1503_s9  }
  0x6e   : > { %p1918_p7 = scmp.ne.s32.totalorder %s1907_s11, 0 }
  0x6f   : > { %s1919_s27 = sld [smem:[#allocation21_spill]] (!%p1918_p7)  ;;  %s299_s19 = sand.u32 (!%p1918_p7), 1, %s1599_s8  }
  0x70   : > { %297 = sbr.rel (%p1918_p7) target bundleno = 927 (0x39f), region = 44  ;;  %s301_s1 = sand.u32 (!%p1918_p7), 1, %s1467_s25  }
  0x71   : > { %s1739_s28 = sshll.u32 (!%p1918_p7), %s301_s1, 4  ;;  %s300_s14 = scalar_lea.sflag (!%p1918_p7), [#allocation5], %s299_s19 }
  0x72   : > { %s303_s12 = scalar_lea.vmem (!%p1918_p7), [#allocation4], %s1739_s28 }
  0x75   : > { %p1920_p12 = scmp.ne.s32.totalorder %s1919_s27, 0 }
  0x77   : > { %1430 = dma.done.wait (%p1920_p12), %s300_s14, 256  }
  0x78   : > { %1432 = vsyncadd (%p1920_p12), %s300_s14, 4294967040  ;;  %p1921_p1 = scmp.eq.s32.totalorder %s1599_s8, 0 }
  0x7a   : > { %1434 = dma.done.wait (%p1921_p1), [#allocation8], 3072   ;;  %p1922_p9 = pmov %p1921_p1 }
  0x7b   : > { %p1923_p8 = pmov %p1921_p1 }
  0x7c   : > { %1436 = vsyncadd (%p1922_p9), [#allocation8], 4294964224 }
  0x7d   : > { %1438 = dma.done.wait (%p1923_p8), [#allocation11], 32   ;;  %p1924_p10 = pmov %p1921_p1 }
  0x7e   : > { %s1925_s11 = sld [smem:[#allocation22_spill]]  ;;  %s322_s24 = sand.u32 1, %s1455_s22  }
  0x7f   : > { %1440 = vsyncadd (%p1924_p10), [#allocation11], 4294967264  ;;  %s975_s13 = sshll.u32 %s322_s24, 5 }
  0x80   : > { %s1755_s2 = scalar_lea.vmem [#allocation12], %s975_s13 }
  0x84   : > { %p1926_p2 = scmp.ne.s32.totalorder %s1925_s11, 0 }
  0x86   : > { %1442 = dma.done.wait (%p1926_p2), %s300_s14, 512  }
  0x87   : > { %1444 = vsyncadd (%p1926_p2), %s300_s14, 4294966784  ;;  %v1504_v0 = vmov 0.0   ;;  %vm1505_vm0 = vmmov 0   ;;  %v1191_v1 = vld [vmem:[#allocation7 + $0x38] sm:$0xff]   ;;  %v1192_v2 = vld [vmem:[#allocation7 + $0x30] sm:$0xff]   ;;  %s1927_s21 = sld [smem:[#allocation20_spill]] }
  0x88   : > { %1020 = vmatprep.subr.bf16.mxu0 %v1504_v0  ;;  %1036 = vmatprep.mubr.msk.bf16.mxu0 %vm1505_vm0, %v1504_v0  ;;  %v1193_v3 = vld [vmem:[#allocation7 + $0x28] sm:$0xff]   ;;  %v1194_v4 = vld [vmem:[#allocation7 + $0x20] sm:$0xff]   ;;  %v1195_v5 = vld [vmem:[#allocation7 + $0x18] sm:$0xff]   ;;  %s1928_s18 = sld [smem:[#allocation19_spill]] }
  0x89   : > { %1021 = vmatpush3.bf16.msra.mxu0 %v1191_v1  ;;  %v1196_v6 = vld [vmem:[#allocation7 + $0x10] sm:$0xff]   ;;  %v1197_v7 = vld [vmem:[#allocation7 + $0x8] sm:$0xff]   ;;  %v1198_v8 = vld [vmem:[#allocation7] sm:$0xff]  }
  0x8a   : > { %1022 = vmatprep.subr.bf16.mxu0 %v1504_v0  ;;  %v357_v9 = vld [vmem:[%s303_s12] sm:$0xff]  ;;  %v358_v10 = vld [vmem:[%s303_s12 + $0x8] sm:$0xff] }
  0x8b   : > { %v359_v11 = vpack.c.bf16 %v358_v10, %v357_v9 }
  0x8d   : > { %1023 = vmatpush3.bf16.msra.mxu0 %v1192_v2  ;;  %p465_p3 = scmp.eq.s32.totalorder %s1927_s21, 0 }
  0x8e   : > { %1024 = vmatprep.subr.bf16.mxu0 %v1504_v0  ;;  %p466_p13 = scmp.eq.s32.totalorder %s1928_s18, 0 }
  0x90   : > { %p467_p4 = pnand %p466_p13, %p465_p3 }
  0x91   : > { %1025 = vmatpush3.bf16.msra.mxu0 %v1193_v3 }
  0x92   : > { %1026 = vmatprep.subr.bf16.mxu0 %v1504_v0 }
  0x95   : > { %1027 = vmatpush3.bf16.msra.mxu0 %v1194_v4 }
  0x96   : > { %1028 = vmatprep.subr.bf16.mxu0 %v1504_v0 }
  0x99   : > { %1029 = vmatpush3.bf16.msra.mxu0 %v1195_v5 }
  0x9a   : > { %1030 = vmatprep.subr.bf16.mxu0 %v1504_v0 }
  0x9d   : > { %1031 = vmatpush3.bf16.msra.mxu0 %v1196_v6 }
  0x9e   : > { %1032 = vmatprep.subr.bf16.mxu0 %v1504_v0 }
  0xa1   : > { %1033 = vmatpush3.bf16.msra.mxu0 %v1197_v7 }
  0xa2   : > { %1034 = vmatprep.subr.bf16.mxu0 %v1504_v0 }
  0xa5   : > { %1035 = vmatpush3.bf16.msra.mxu0 %v1198_v8 }
  0xa8   : > { %1037 = vmatmul.mubr.bf16.vlgmr.msra.gmra.mxu0 %v359_v11 }
 0x168   : > { %v1769_v12 = vpop.f32.mrf.mxu0 }
 0x16a   : > { %v1038_v13 = vpop.f32.mrf.mxu0  ;;  %470 = sbr.rel (%p467_p4) target bundleno = 369 (0x171), region = 68 }
 0x16c   : > { %v1771_v14 = vpop.f32.mrf.mxu0 }
 0x16e   : > { %v1039_v15 = vpop.f32.mrf.mxu0 }
 0x16f   : > { %v1506_v16 = vmov 0.0  }
 0x170   : > { %471 = vst [vmem:[#allocation2] sm:$0x3] %v1506_v16 }
 0x171 PF: > { %s1929_s15 = sld [smem:[#allocation20_spill]] }
 0x177   : > { %p984_p11 = scmp.ne.s32.totalorder %s1929_s15, 0 }
 0x179   : > { %474 = sbr.rel (%p984_p11) target bundleno = 401 (0x191), region = 72 }
 0x17e   : > { %v476_v17 = vadd.f32 %v1771_v14, %v1769_v12  ;;  %v486_v18 = vmul.f32 %v1769_v12, %v1769_v12  ;;  %v487_v19 = vmul.f32 %v1771_v14, %v1771_v14  ;;  %v475_v30 = vld [vmem:[#allocation2] sm:$0x1]  ;;  %v485_v33 = vld [vmem:[#allocation2 + $0x1] sm:$0x1] }
 0x180   : > { %v477_v20 = vrot.slane %v476_v17, 4  ;;  %v488_v21 = vadd.f32 %v487_v19, %v486_v18 }
 0x182   : > { %v478_v22 = vadd.f32 %v477_v20, %v476_v17  ;;  %v489_v23 = vrot.slane %v488_v21, 4 }
 0x184   : > { %v479_v24 = vrot.slane %v478_v22, 2  ;;  %v490_v25 = vadd.f32 %v489_v23, %v488_v21 }
 0x186   : > { %v480_v26 = vadd.f32 %v479_v24, %v478_v22  ;;  %v491_v27 = vrot.slane %v490_v25, 2 }
 0x188   : > { %v481_v28 = vrot.slane %v480_v26, 1  ;;  %v492_v29 = vadd.f32 %v491_v27, %v490_v25 }
 0x18a   : > { %v482_v31 = vadd.f32 %v481_v28, %v480_v26  ;;  %v493_v32 = vrot.slane %v492_v29, 1 }
 0x18c   : > { %v483_v34 = vadd.f32 %v482_v31, %v475_v30  ;;  %v494_v35 = vadd.f32 %v493_v32, %v492_v29 }
 0x18e   : > { %484 = vst [vmem:[#allocation2] sm:$0x1] %v483_v34  ;;  %v495_v36 = vadd.f32 %v494_v35, %v485_v33 }
 0x190   : > { %496 = vst [vmem:[#allocation2 + $0x1] sm:$0x1] %v495_v36 }
 0x191 PF: > { %s1930_s16 = sld [smem:[#allocation20_spill]] }
 0x197   : > { %p497_p0 = scmp.eq.s32.totalorder %s1930_s16, 1 }
 0x199   : > { %p498_p5 = pnand %p497_p0, %p466_p13 }
 0x19a   : > { %s1932_s1 = sld [smem:[#allocation24_spill]] (!%p498_p5) }
 0x19b   : > { %501 = sbr.rel (%p498_p5) target bundleno = 448 (0x1c0), region = 76 }
 0x1a0   : > { %v502_v37 = vld [vmem:[#allocation2] sm:$0x1]  ;;  %v504_v38 = vld [vmem:[#allocation2 + $0x1] sm:$0x1]  ;;  %v1507_v41 = vmov 0.0  }
 0x1a1   : > { %v503_v39 = vmul.f32 0.03125, %v502_v37  ;;  %v505_v40 = vmul.f32 0.03125, %v504_v38  ;;  %518 = vst [vmem:[#allocation3] sm:$0xf] %v1507_v41  ;;  %v509_v46 = vld [vmem:[%s1932_s1] sm:$0x1] }
 0x1a2   : > { %v513_v49 = vld [vmem:[%s1932_s1 + $0x1] sm:$0x1] }
 0x1a3   : > { %v506_v42 = vmul.f32 %v503_v39, %v503_v39 }
 0x1a5   : > { %v507_v43 = vsub.f32 %v505_v40, %v506_v42 }
 0x1a7   : > { %v508_v44 = vmax.f32 %v507_v43, 0.0 }
 0x1a9   : > { %v510_v45 = vadd.f32 1e-05, %v508_v44 }
 0x1ab   : > { %1199 = vrsqrt.f32 %v510_v45 }
 0x1b8   : > { %v1200_v47 = vpop.eup %1199 }
 0x1b9   : > { %v512_v48 = vmul.f32 %v1200_v47, %v509_v46 }
 0x1bb   : > { %516 = vst [vmem:[#allocation2] sm:$0x1] %v512_v48  ;;  %v514_v50 = vmul.f32 %v512_v48, %v503_v39 }
 0x1bd   : > { %v515_v51 = vsub.f32 %v513_v49, %v514_v50 }
 0x1bf   : > { %517 = vst [vmem:[#allocation2 + $0x1] sm:$0x1] %v515_v51 }
 0x1c0 PF: > { %s1933_s12 = sld [smem:[#allocation20_spill]] }
 0x1c6   : > { %p985_p6 = scmp.ne.s32.totalorder %s1933_s12, 1 }
 0x1c8   : > { %521 = sbr.rel (%p985_p6) target bundleno = 723 (0x2d3), region = 80 }
 0x1cd   : > { %v1201_v52 = vld [vmem:[#allocation9 + $0x74] ss:$8 sps:$4 sm:$0xff]   ;;  %v1203_v53 = vld [vmem:[#allocation9 + $0x70] ss:$8 sps:$4 sm:$0xff]   ;;  %v1508_v54 = vmov 0   ;;  %v1509_v18 = vmov 1.0   ;;  %v557_v31 = vlaneseq }
 0x1ce   : > { %679 = vmatprep.mubr.bf16.mxu0 %v1508_v54  ;;  %647 = vmatprep.subr.bf16.mxu0 %v1201_v52  ;;  %v1204_v55 = vld [vmem:[#allocation9 + $0x64] ss:$8 sps:$4 sm:$0xff]   ;;  %v1206_v56 = vld [vmem:[#allocation9 + $0x60] ss:$8 sps:$4 sm:$0xff]   ;;  %v1207_v57 = vld [vmem:[#allocation9 + $0x54] ss:$8 sps:$4 sm:$0xff]  }
 0x1cf   : > { %648 = vmatpush1.bf16.msra.mxu0 %v1203_v53  ;;  %v1209_v58 = vld [vmem:[#allocation9 + $0x50] ss:$8 sps:$4 sm:$0xff]   ;;  %v1210_v59 = vld [vmem:[#allocation9 + $0x44] ss:$8 sps:$4 sm:$0xff]   ;;  %v1212_v60 = vld [vmem:[#allocation9 + $0x40] ss:$8 sps:$4 sm:$0xff]  }
 0x1d0   : > { %649 = vmatprep.subr.bf16.mxu0 %v1204_v55  ;;  %v1213_v61 = vld [vmem:[#allocation9 + $0x34] ss:$8 sps:$4 sm:$0xff]   ;;  %v1215_v62 = vld [vmem:[#allocation9 + $0x30] ss:$8 sps:$4 sm:$0xff]   ;;  %v1216_v0 = vld [vmem:[#allocation9 + $0x24] ss:$8 sps:$4 sm:$0xff]  }
 0x1d1   : > { %v986_v63 = vld [vmem:[#allocation2] ss:$0 sm:$0xff]  ;;  %v1218_v3 = vld [vmem:[#allocation9 + $0x20] ss:$8 sps:$4 sm:$0xff]   ;;  %v987_v4 = vld [vmem:[#allocation2 + $0x1] ss:$0 sm:$0xff] }
 0x1d2   : > { %v527_v1 = vmul.f32 %v986_v63, %v1769_v12  ;;  %v528_v2 = vmul.f32 %v986_v63, %v1771_v14  ;;  %v1219_v5 = vld [vmem:[#allocation9 + $0x14] ss:$8 sps:$4 sm:$0xff]   ;;  %v1221_v8 = vld [vmem:[#allocation9 + $0x10] ss:$8 sps:$4 sm:$0xff]   ;;  %v1222_v9 = vld [vmem:[#allocation9 + $0x4] ss:$8 sps:$4 sm:$0xff]  }
 0x1d3   : > { %650 = vmatpush1.bf16.msra.mxu0 %v1206_v56  ;;  %v1224_v12 = vld [vmem:[#allocation9] ss:$8 sps:$4 sm:$0xff]   ;;  %v692_v16 = vld [vmem:[%s1755_s2 + $0x10] sm:$0xff]  ;;  %v1510_v27 = vmov 1966171168   ;;  %v558_v37 = vshrl.u32 %v557_v31, 7 }
 0x1d4   : > { %651 = vmatprep.subr.bf16.mxu0 %v1207_v57  ;;  %v534_v6 = vadd.f32 %v987_v4, %v527_v1  ;;  %v535_v7 = vadd.f32 %v987_v4, %v528_v2  ;;  %v690_v14 = vld [vmem:[%s1755_s2] sm:$0xff]  ;;  %v691_v15 = vld [vmem:[%s1755_s2 + $0x8] sm:$0xff]  ;;  %v1798_v17 = vld [vmem:[%s1755_s2 + $0x18] sm:$0xff]  ;;  %vm696_vm3 = vcmp.ne.f32.partialorder %v692_v16, %v692_v16  ;;  %v733_v28 = vunpack.c.l.s4 %v1510_v27 }
 0x1d5   : > { %vm694_vm1 = vcmp.ne.f32.partialorder %v690_v14, %v690_v14  ;;  %vm695_vm2 = vcmp.ne.f32.partialorder %v691_v15, %v691_v15  ;;  %vm697_vm4 = vcmp.ne.f32.partialorder %v1798_v17, %v1798_v17  ;;  %v757_v21 = vsel %vm696_vm3, 0.0, %v1509_v18  ;;  %v754_v47 = vld [vmem:[#allocation3 + $0x1] ss:$2 sm:$0x3]  ;;  %v555_v50 = vld [vmem:[#allocation10] sm:$0x3] }
 0x1d6   : > { %v536_v10 = vmax.f32 %v534_v6, 0.0  ;;  %v537_v11 = vmax.f32 %v535_v7, 0.0  ;;  %v755_v19 = vsel %vm694_vm1, 0.0, %v1509_v18  ;;  %v756_v20 = vsel %vm695_vm2, 0.0, %v1509_v18 }
 0x1d7   : > { %652 = vmatpush1.bf16.msra.mxu0 %v1209_v58  ;;  %v758_v22 = vsel %vm697_vm4, 0.0, %v1509_v18  ;;  %v759_v23 = vadd.f32 %v757_v21, %v755_v19  ;;  %v734_v34 = vunpack.c.0.s8 %v733_v28  ;;  %vm1808_vm5 = vcmp.lt.s32.totalorder %v557_v31, 256 }
 0x1d8   : > { %653 = vmatprep.subr.bf16.mxu0 %v1210_v59  ;;  %v538_v13 = vpack.c.bf16 %v537_v11, %v536_v10  ;;  %v766_v24 = vadd.f32 %v758_v22, %v756_v20  ;;  %v559_v49 = vsub.s32 0, %v558_v37  ;;  %v563_v51 = vsub.s32 1, %v558_v37 }
 0x1d9   : > { %v760_v25 = vrot.slane %v759_v23, 4  ;;  %v737_v40 = vsub.s32 %v734_v34, %v558_v37  ;;  %v698_v55 = vsel %vm694_vm1, 0.0, %v690_v14  ;;  %v699_v58 = vsel %vm695_vm2, 0.0, %v691_v15 }
 0x1da   : > { %v767_v26 = vrot.slane %v766_v24, 4  ;;  %v560_v52 = vrot.slane %v555_v50, %v559_v49  ;;  %v564_v53 = vrot.slane %v555_v50, %v563_v51  ;;  %v701_v2 = vsel %vm697_vm4, 0.0, %v1798_v17  ;;  %v710_v17 = vld [vmem:[#allocation3] ss:$2 sm:$0x3] }
 0x1db   : > { %654 = vmatpush1.bf16.msra.mxu0 %v1212_v60  ;;  %v761_v29 = vadd.f32 %v760_v25, %v759_v23 }
 0x1dc   : > { %655 = vmatprep.subr.bf16.mxu0 %v1213_v61  ;;  %v768_v30 = vadd.f32 %v767_v26, %v766_v24 }
 0x1dd   : > { %v762_v32 = vrot.slane %v761_v29, 2 }
 0x1de   : > { %v769_v33 = vrot.slane %v768_v30, 2 }
 0x1df   : > { %656 = vmatpush1.bf16.msra.mxu0 %v1215_v62  ;;  %v763_v35 = vadd.f32 %v762_v32, %v761_v29  ;;  %v700_v62 = vsel %vm696_vm3, 0.0, %v692_v16 }
 0x1e0   : > { %657 = vmatprep.subr.bf16.mxu0 %v1216_v0  ;;  %v770_v36 = vadd.f32 %v769_v33, %v768_v30 }
 0x1e1   : > { %v764_v38 = vrot.slane %v763_v35, 1 }
 0x1e2   : > { %v771_v39 = vrot.slane %v770_v36, 1 }
 0x1e3   : > { %658 = vmatpush1.bf16.msra.mxu0 %v1218_v3  ;;  %v765_v41 = vadd.f32 %v764_v38, %v763_v35 }
 0x1e4   : > { %659 = vmatprep.subr.bf16.mxu0 %v1219_v5  ;;  %v772_v42 = vadd.f32 %v771_v39, %v770_v36 }
 0x1e6   : > { %v775_v43 = vcombine.low %v765_v41, %v772_v42 }
 0x1e7   : > { %660 = vmatpush1.bf16.msra.mxu0 %v1221_v8 }
 0x1e8   : > { %661 = vmatprep.subr.bf16.mxu0 %v1222_v9  ;;  %v782_v44 = vrot.slane %v775_v43, %v737_v40 }
 0x1ea   : > { %v789_v45 = vrot.slane %v782_v44, %v737_v40 }
 0x1eb   : > { %662 = vmatpush1.bf16.msra.mxu0 %v1224_v12 }
 0x1ec   : > { %v791_v48 = vadd.f32 %v789_v45, %v754_v47 }
 0x1ee   : > { %680 = vmatmul.mubr.bf16.vlgmr.msra.gmra.mxu0 %v538_v13  ;;  %792 = vst.msk [vmem:[#allocation3 + $0x1] ss:$2 sm:$0x3] %vm1808_vm5, %v791_v48 }
 0x2ae   : > { %v681_v54 = vpop.f32.mrf.mxu0 }
 0x2af   : > { %v682_v56 = vadd.f32 %v681_v54, %v560_v52 }
 0x2b0   : > { %v683_v57 = vpop.f32.mrf.mxu0 }
 0x2b1   : > { %v702_v59 = vsub.f32 %v682_v56, %v698_v55  ;;  %v684_v60 = vadd.f32 %v683_v57, %v564_v53 }
 0x2b2   : > { %v685_v61 = vpop.f32.mrf.mxu0 }
 0x2b3   : > { %v703_v63 = vsub.f32 %v684_v60, %v699_v58  ;;  %v686_v0 = vadd.f32 %v685_v61, %v560_v52  ;;  %v706_v3 = vsel %vm694_vm1, 0.0, %v702_v59 }
 0x2b4   : > { %v687_v1 = vpop.f32.mrf.mxu0  ;;  %v711_v9 = vmul.f32 %v706_v3, %v706_v3 }
 0x2b5   : > { %v704_v4 = vsub.f32 %v686_v0, %v700_v62  ;;  %v688_v5 = vadd.f32 %v687_v1, %v564_v53  ;;  %v707_v6 = vsel %vm695_vm2, 0.0, %v703_v63 }
 0x2b6   : > { %v712_v12 = vmul.f32 %v707_v6, %v707_v6 }
 0x2b7   : > { %v708_v7 = vsel %vm696_vm3, 0.0, %v704_v4  ;;  %v705_v8 = vsub.f32 %v688_v5, %v701_v2 }
 0x2b8   : > { %v713_v10 = vmul.f32 %v708_v7, %v708_v7 }
 0x2b9   : > { %v709_v11 = vsel %vm697_vm4, 0.0, %v705_v8 }
 0x2ba   : > { %v715_v13 = vadd.f32 %v713_v10, %v711_v9  ;;  %v714_v18 = vmul.f32 %v709_v11, %v709_v11 }
 0x2bc   : > { %v716_v19 = vrot.slane %v715_v13, 4  ;;  %v722_v20 = vadd.f32 %v714_v18, %v712_v12 }
 0x2be   : > { %v717_v14 = vadd.f32 %v716_v19, %v715_v13  ;;  %v723_v21 = vrot.slane %v722_v20, 4 }
 0x2c0   : > { %v718_v22 = vrot.slane %v717_v14, 2  ;;  %v724_v23 = vadd.f32 %v723_v21, %v722_v20 }
 0x2c2   : > { %v719_v15 = vadd.f32 %v718_v22, %v717_v14  ;;  %v725_v24 = vrot.slane %v724_v23, 2 }
 0x2c4   : > { %v720_v16 = vrot.slane %v719_v15, 1  ;;  %v726_v25 = vadd.f32 %v725_v24, %v724_v23 }
 0x2c6   : > { %v727_v26 = vrot.slane %v726_v25, 1  ;;  %v721_v27 = vadd.f32 %v720_v16, %v719_v15 }
 0x2c8   : > { %v728_v28 = vadd.f32 %v727_v26, %v726_v25 }
 0x2ca   : > { %v731_v29 = vcombine.low %v721_v27, %v728_v28 }
 0x2cc   : > { %v738_v30 = vrot.slane %v731_v29, %v737_v40 }
 0x2ce   : > { %v745_v31 = vrot.slane %v738_v30, %v737_v40 }
 0x2d0   : > { %v747_v32 = vadd.f32 %v745_v31, %v710_v17 }
 0x2d2   : > { %752 = vst.msk [vmem:[#allocation3] ss:$2 sm:$0x3] %vm1808_vm5, %v747_v32 }
 0x2d3 PF: > { %s1936_s11 = sld [smem:[#allocation19_spill]] }
 0x2d9   : > { %p793_p7 = scmp.eq.s32.totalorder %s1936_s11, 1 }
 0x2db   : > { %p794_p12 = pnand %p793_p7, %p497_p0 }
 0x2dd   : > { %797 = sbr.rel (%p794_p12) target bundleno = 906 (0x38a), region = 84 }
 0x2e2   : > { %v800_v33 = vlaneseq  ;;  %v817_v35 = vld [vmem:[#allocation3 + $0x1] ss:$2 sm:$0x3]  ;;  %v798_v36 = vld [vmem:[#allocation3] ss:$2 sm:$0x3] }
 0x2e3   : > { %vm810_vm6 = vcmask 1040384   ;;  %vm837_vm7 = vcmask 0  }
 0x2e4   : > { %v801_v34 = vshrl.u32 %v800_v33, 7 }
 0x2e6   : > { %v802_v37 = vsub.s32 0, %v801_v34  ;;  %v806_v38 = vsub.s32 1, %v801_v34 }
 0x2e8   : > { %v822_v39 = vrot.slane %v817_v35, %v802_v37  ;;  %v826_v40 = vrot.slane %v817_v35, %v806_v38  ;;  %v803_v41 = vrot.slane %v798_v36, %v802_v37  ;;  %v807_v42 = vrot.slane %v798_v36, %v806_v38 }
 0x2ea   : > { %v829_v43 = vsel %vm810_vm6, %v822_v39, 0.0  ;;  %v830_v44 = vsel %vm810_vm6, %v826_v40, 0.0  ;;  %v811_v45 = vsel %vm810_vm6, %v803_v41, 0.0  ;;  %v812_v46 = vsel %vm810_vm6, %v807_v42, 0.0 }
 0x2eb   : > { %v831_v47 = vadd.f32 %v830_v44, %v829_v43  ;;  %v813_v48 = vadd.f32 %v812_v46, %v811_v45 }
 0x2ed   : > { %832 = vadd.xlane.f32.xlu0 %v831_v47 }
 0x2f1   : > { %814 = vadd.xlane.f32.xlu0 %v813_v48 }
 0x376   : > { %v833_v49 = vpop.xlane.xlu0 %832 }
 0x377   : > { %v834_v50 = vmax.f32 %v833_v49, 1.0 }
 0x379   : > { %1225 = vrcp.f32 %v834_v50 }
 0x37a   : > { %v815_v51 = vpop.xlane.xlu0 %814 }
 0x386   : > { %v1226_v52 = vpop.eup %1225 }
 0x387   : > { %v836_v53 = vmul.f32 %v1226_v52, %v815_v51 }
 0x389   : > { %838 = vst.msk [vmem:[#allocation13] sm:$0x1] %vm837_vm7, %v836_v53 }
 0x38a PF: > { %p1084_p1 = scmp.eq.s32.totalorder %s1599_s8, 3  ;;  %s1511_s13 = smov [#allocation13]  }
 0x38b   : > { %s846_s2 = sshll.u32 %s1511_s13, 4  ;;  %s847_s2 = int_to_ptr.vmem [resolvable:$true] %s846_s2 }
 0x38c   : > { %s1361_s21 = scalar_lea.vmem %s847_s2, 16  ;;  %s1367_s18 = scalar_lea.vmem %s847_s2, 32 }
 0x38d   : > { %p1362_p9 = scmp.ne.s32.totalorder %s847_s2, %s1361_s21  ;;  %p1368_p2 = scmp.lt.s32.totalorder %s847_s2, %s847_s2 }
 0x38e   : > { %p1369_p3 = scmp.lt.s32.totalorder %s1367_s18, %s1361_s21 }
 0x38f   : > { %p1363_p8 = pnand %p1362_p9, %p1084_p1 }
 0x390   : > { %p1370_p13 = por %p1369_p3, %p1368_p2 }
 0x391   : > { %p1364_p10 = pneg %p1363_p8 }
 0x393   : > { %p1371_p4 = pnand %p1370_p13, %p1364_p10 }
 0x395   : > { %1374 = shalt.err (!%p1371_p4)
}
 0x396   : > { %s1938_s9 = sld [smem:[#allocation25_spill]] }
 0x39c   : > { %1057 = dma.vmem_to_hbm [thread:$0]  (%p1084_p1), %s847_s2, 16, %s1938_s9, [#allocation6]  }
 0x39d   : > { %1446 = dma.done.wait (%p1084_p1), [#allocation6], 16  }
 0x39e   : > { %1448 = vsyncadd (%p1084_p1), [#allocation6], 4294967280 }
 0x39f PF: > { %s22_s7 = sadd.s32 1, %s1491_s7   ;;  %s1939_s21 = smov %s1455_s22 }
 0x3a0   : > { %p19_p11 = scmp.ge.s32.totalorder %s22_s7, 6   ;;  %s1940_s22 = smov %s1459_s23 }
 0x3a1   : > { %s1941_s23 = smov %s1728_s10  ;;  %s1942_s24 = smov %s1467_s25 }
 0x3a2   : > { %s1943_s25 = smov %s1471_s26  ;;  %s1944_s26 = smov %s1665_s17 }
 0x3a3   : > { %s1945_s27 = smov %s1483_s29  ;;  %s1946_s28 = smov %s1487_s30 }
 0x3a4   : > { %s1947_s29 = smov %s1950_s20  ;;  %s1948_s30 = smov %s1954_s6 }
 0x3a5   :  { %21 = sbr.rel (!%p19_p11) target bundleno = 14 (0xe), region = 126 }
 0x3aa   :  { %859 = vsyncpa [#allocation5], 1 }
 0x3ab   :  { %861 = vsyncpa [#allocation5 + $0x1], 1 }
 0x3ac   :  { %862 = vsyncpa [#allocation8], 1 }
 0x3ad   :  { %863 = vsyncpa [#allocation11], 1 }
 0x3ae   :  { %864 = vsyncpa [#allocation6], 1 }
 0x3af   :  { %866 = vsyncpa [#allocation6 + $0x1], 1 }

</bundles_post_ra>
